<compile_context>
chip_gen: v5e
topology: v5e:2x2
jax: 0.10.0
libtpu: 0.0.40
codegen_flags: <defaults>
</compile_context>

<pallas_src>
import functools

import jax
import jax.numpy as jnp
from jax.experimental import pallas as pl
from jax.experimental.pallas import tpu as pltpu

BN_EPS = 1e-5
ROW_ALIGN = 16  # sublane alignment that also covers bf16 (16, 128) packing


def _round_up(x: int, m: int) -> int:
    return ((x + m - 1) // m) * m


# --------------------------------------------------------------------------- shared tile math
# (used verbatim by the kernels and by the pure-XLA verification path)


def _layer1(xa, xb, raw, w1a, w1b, w1r, b1):
    """ReLU(xa@(W1a+W1d) + xb@(W1b-W1d) + raw@W1r + b1) -- concat/diff folded into the weights."""
    h = (jnp.dot(xa, w1a, preferred_element_type=jnp.float32)
         + jnp.dot(xb, w1b, preferred_element_type=jnp.float32)
         + jnp.dot(raw, w1r, preferred_element_type=jnp.float32)
         + b1)
    return jnp.maximum(h, 0.0)


def _layer(h, w, b):
    return jnp.maximum(jnp.dot(h, w, preferred_element_type=jnp.float32) + b, 0.0)


# --------------------------------------------------------------------------- kernels


def _write_partial_stats(stats_ref, h, *, tb, batch):
    """Write this tile's [sum; sum-of-squares] of h; padded rows masked on the last tile only."""

    def write(hm):
        stats_ref[...] = jnp.concatenate(
            [jnp.sum(hm, axis=0, keepdims=True),
             jnp.sum(hm * hm, axis=0, keepdims=True)], axis=0)[None]

    if batch % tb == 0:          # static: no ragged tile, no masking anywhere
        write(h)
    else:
        i = pl.program_id(0)
        last = pl.num_programs(0) - 1

        @pl.when(i != last)
        def _():
            write(h)

        @pl.when(i == last)
        def _():
            rows = i * tb + jax.lax.broadcasted_iota(jnp.int32, (h.shape[0], 1), 0)
            write(jnp.where(rows < batch, h, 0.0))


def _stats1_kernel(xa_ref, xb_ref, raw_ref, w1a_ref, w1b_ref, w1r_ref, b1_ref,
                   stats_ref, *h1_out, tb, batch, cdt, emit_h1):
    h1 = _layer1(xa_ref[...].astype(cdt), xb_ref[...].astype(cdt), raw_ref[...].astype(cdt),
                 w1a_ref[...], w1b_ref[...], w1r_ref[...], b1_ref[...])
    _write_partial_stats(stats_ref, h1, tb=tb, batch=batch)
    if emit_h1:
        h1_out[0][...] = h1.astype(h1_out[0].dtype)


def _stats2_from_x_kernel(xa_ref, xb_ref, raw_ref, w1a_ref, w1b_ref, w1r_ref, b1_ref,
                          w2_ref, b2_ref, stats_ref, *, tb, batch, cdt):
    h1 = _layer1(xa_ref[...].astype(cdt), xb_ref[...].astype(cdt), raw_ref[...].astype(cdt),
                 w1a_ref[...], w1b_ref[...], w1r_ref[...], b1_ref[...])
    h2 = _layer(h1.astype(cdt), w2_ref[...], b2_ref[...])
    _write_partial_stats(stats_ref, h2, tb=tb, batch=batch)


def _stats2_from_h1_kernel(h1_ref, w2_ref, b2_ref, stats_ref, *, tb, batch, cdt):
    h2 = _layer(h1_ref[...].astype(cdt), w2_ref[...], b2_ref[...])
    _write_partial_stats(stats_ref, h2, tb=tb, batch=batch)


def _final_from_x_kernel(xa_ref, xb_ref, raw_ref, w1a_ref, w1b_ref, w1r_ref, b1_ref,
                         w2_ref, b2_ref, wout_ref, bout_ref, out_ref, *, cdt):
    h1 = _layer1(xa_ref[...].astype(cdt), xb_ref[...].astype(cdt), raw_ref[...].astype(cdt),
                 w1a_ref[...], w1b_ref[...], w1r_ref[...], b1_ref[...])
    h2 = _layer(h1.astype(cdt), w2_ref[...], b2_ref[...])
    out = (jnp.dot(h2.astype(cdt), wout_ref[...], preferred_element_type=jnp.float32)
           + bout_ref[...])
    out_ref[...] = out.astype(out_ref.dtype)


def _final_from_h1_kernel(h1_ref, w2_ref, b2_ref, wout_ref, bout_ref, out_ref, *, cdt):
    h2 = _layer(h1_ref[...].astype(cdt), w2_ref[...], b2_ref[...])
    out = (jnp.dot(h2.astype(cdt), wout_ref[...], preferred_element_type=jnp.float32)
           + bout_ref[...])
    out_ref[...] = out.astype(out_ref.dtype)


# --------------------------------------------------------------------------- wrapper


@functools.partial(
    jax.jit,
    static_argnames=("k_classes", "output_feature_dim", "tile_batch", "compute_dtype",
                     "use_pallas", "cache_h1"))
def edge_feature_net(xa, xb, raw, params, *, k_classes: int, output_feature_dim: int = 32,
                     tile_batch: int = 4096, compute_dtype=jnp.bfloat16, use_pallas: bool = True,
                     cache_h1=None):
    B, comb_dim = xa.shape
    raw_dim = raw.shape[1]
    h1_dim = params["w1"].shape[1]
    h2_dim = params["w2"].shape[1]
    assert params["w1"].shape[0] == 3 * comb_dim + raw_dim
    assert h2_dim == output_feature_dim

    cdt = compute_dtype
    isz = jnp.dtype(cdt).itemsize
    din_read = 2 * comb_dim + raw_dim                  # x elements actually read per pass
    if cache_h1 is None:
        # Two extra f32 reads of [xa|xb|raw] (recompute) vs one write + two reads of a cdt h1
        # cache: cache only pays off for wide edge features.
        cache_h1 = 2 * 4 * din_read > 3 * h1_dim * isz

    # ---- host-side static weight folding: concat/diff folded into layer-1 weights ----------
    w1 = params["w1"]
    w1a, w1b, w1d, w1r = (w1[:comb_dim], w1[comb_dim:2 * comb_dim],
                          w1[2 * comb_dim:3 * comb_dim], w1[3 * comb_dim:])
    w1af = (w1a + w1d).astype(cdt)
    w1bf = (w1b - w1d).astype(cdt)
    w1rf = w1r.astype(cdt)
    b1 = params["b1"].reshape(1, h1_dim).astype(jnp.float32)

    # ---- batch tiling -----------------------------------------------------------------------
    tb = _round_up(min(tile_batch, _round_up(B, ROW_ALIGN)), ROW_ALIGN)
    n_tiles = pl.cdiv(B, tb)

    row_spec = lambda c: pl.BlockSpec((tb, c), lambda i: (i, 0))
    wspec = lambda r, c: pl.BlockSpec((r, c), lambda i: (0, 0))          # VMEM-resident weights
    stats_spec = lambda h: pl.BlockSpec((1, 2, h), lambda i: (i, 0, 0))  # per-tile partial stats

    # lane-dense packed output slab: columns [0:h2)=rep, [h2:h2+k)=logits, rest zero padding
    ncols = h2_dim + k_classes
    out_w = 64 if ncols <= 64 else _round_up(ncols, 128)

    vmem_need = 2 * tb * (4 * din_read + isz * h1_dim + isz * out_w) + (2 << 20)
    cp = pltpu.CompilerParams(
        dimension_semantics=("parallel",),  # every pass shards across v7x's 2 TensorCores
        vmem_limit_bytes=int(min(max(vmem_need, 32 << 20), 60 << 20)))

    x_in_specs = [row_spec(comb_dim), row_spec(comb_dim), row_spec(raw_dim),
                  wspec(comb_dim, h1_dim), wspec(comb_dim, h1_dim),
                  wspec(raw_dim, h1_dim), wspec(1, h1_dim)]

    l1_flops = 2 * B * din_read * h1_dim
    l2_flops = 2 * B * h1_dim * h2_dim
    l3_flops = 2 * B * h2_dim * out_w
    x_bytes = B * din_read * 4
    h1_bytes = B * h1_dim * isz
    w_bytes = (din_read * h1_dim + h1_dim * h2_dim + h2_dim * out_w) * isz

    # ---- pass 1: per-tile partial sum / sum-of-squares of h1 ---------------------------------
    h1c = None
    if use_pallas:
        stats_shape = jax.ShapeDtypeStruct((n_tiles, 2, h1_dim), jnp.float32)
        kern1 = functools.partial(_stats1_kernel, tb=tb, batch=B, cdt=cdt, emit_h1=cache_h1)
        if cache_h1:
            stats1_p, h1c = pl.pallas_call(
                kern1,
                out_shape=(stats_shape, jax.ShapeDtypeStruct((B, h1_dim), cdt)),
                grid=(n_tiles,),
                in_specs=x_in_specs,
                out_specs=(stats_spec(h1_dim), row_spec(h1_dim)),
                compiler_params=cp,
                cost_estimate=pl.CostEstimate(flops=l1_flops, transcendentals=0,
                                              bytes_accessed=x_bytes + w_bytes + h1_bytes),
            )(xa, xb, raw, w1af, w1bf, w1rf, b1)
        else:
            stats1_p = pl.pallas_call(
                kern1,
                out_shape=stats_shape,
                grid=(n_tiles,),
                in_specs=x_in_specs,
                out_specs=stats_spec(h1_dim),
                compiler_params=cp,
                cost_estimate=pl.CostEstimate(flops=l1_flops, transcendentals=0,
                                              bytes_accessed=x_bytes + w_bytes),
            )(xa, xb, raw, w1af, w1bf, w1rf, b1)
        stats1 = jnp.sum(stats1_p, axis=0)
    else:  # pure-XLA path with identical folded math (verification of the low-precision mode)
        h1_full = _layer1(xa.astype(cdt), xb.astype(cdt), raw.astype(cdt),
                          w1af, w1bf, w1rf, b1)
        stats1 = jnp.concatenate([jnp.sum(h1_full, axis=0, keepdims=True),
                                  jnp.sum(h1_full * h1_full, axis=0, keepdims=True)], axis=0)

    # ---- fold BN1 (training-mode batch stats, biased variance) into layer 2 ------------------
    mean1 = stats1[0:1] / B
    var1 = jnp.maximum(stats1[1:2] / B - mean1 * mean1, 0.0)
    scale1 = params["g1"].reshape(1, h1_dim) * jax.lax.rsqrt(var1 + BN_EPS)
    shift1 = params["be1"].reshape(1, h1_dim) - mean1 * scale1
    w2 = params["w2"]
    w2eff = (scale1.reshape(h1_dim, 1) * w2).astype(cdt)
    b2eff = (shift1 @ w2 + params["b2"].reshape(1, h2_dim)).astype(jnp.float32)

    # ---- pass 2: per-tile partial stats of h2 -------------------------------------------------
    if use_pallas:
        stats_shape2 = jax.ShapeDtypeStruct((n_tiles, 2, h2_dim), jnp.float32)
        if cache_h1:
            stats2_p = pl.pallas_call(
                functools.partial(_stats2_from_h1_kernel, tb=tb, batch=B, cdt=cdt),
                out_shape=stats_shape2,
                grid=(n_tiles,),
                in_specs=[row_spec(h1_dim), wspec(h1_dim, h2_dim), wspec(1, h2_dim)],
                out_specs=stats_spec(h2_dim),
                compiler_params=cp,
                cost_estimate=pl.CostEstimate(flops=l2_flops, transcendentals=0,
                                              bytes_accessed=h1_bytes + w_bytes),
            )(h1c, w2eff, b2eff)
        else:
            stats2_p = pl.pallas_call(
                functools.partial(_stats2_from_x_kernel, tb=tb, batch=B, cdt=cdt),
                out_shape=stats_shape2,
                grid=(n_tiles,),
                in_specs=x_in_specs + [wspec(h1_dim, h2_dim), wspec(1, h2_dim)],
                out_specs=stats_spec(h2_dim),
                compiler_params=cp,
                cost_estimate=pl.CostEstimate(flops=l1_flops + l2_flops, transcendentals=0,
                                              bytes_accessed=x_bytes + w_bytes),
            )(xa, xb, raw, w1af, w1bf, w1rf, b1, w2eff, b2eff)
        stats2 = jnp.sum(stats2_p, axis=0)
    else:
        h2_full = _layer(h1_full.astype(cdt), w2eff, b2eff)
        stats2 = jnp.concatenate([jnp.sum(h2_full, axis=0, keepdims=True),
                                  jnp.sum(h2_full * h2_full, axis=0, keepdims=True)], axis=0)

    # ---- fold BN2 + logit head into one lane-dense output matmul -----------------------------
    mean2 = stats2[0:1] / B
    var2 = jnp.maximum(stats2[1:2] / B - mean2 * mean2, 0.0)
    scale2 = params["g2"].reshape(1, h2_dim) * jax.lax.rsqrt(var2 + BN_EPS)
    shift2 = params["be2"].reshape(1, h2_dim) - mean2 * scale2

    pad_cols = out_w - h2_dim - k_classes
    w3p = jnp.pad(params["w3"], ((0, 0), (0, pad_cols)))
    b3p = jnp.pad(params["b3"].reshape(1, k_classes), ((0, 0), (0, pad_cols)))
    # rep    = h2 * scale2 + shift2            = h2 @ diag(scale2) + shift2
    # logits = rep @ W3 + b3                   = h2 @ (scale2^T * W3) + (shift2 @ W3 + b3)
    wout = jnp.concatenate([jnp.diag(scale2[0]), scale2.reshape(h2_dim, 1) * w3p],
                           axis=1).astype(cdt)
    bout = jnp.concatenate([shift2, shift2 @ w3p + b3p], axis=1).astype(jnp.float32)

    # ---- pass 3: final forward, packed lane-dense compute_dtype output -----------------------
    if use_pallas:
        if cache_h1:
            slab = pl.pallas_call(
                functools.partial(_final_from_h1_kernel, cdt=cdt),
                out_shape=jax.ShapeDtypeStruct((B, out_w), cdt),
                grid=(n_tiles,),
                in_specs=[row_spec(h1_dim), wspec(h1_dim, h2_dim), wspec(1, h2_dim),
                          wspec(h2_dim, out_w), wspec(1, out_w)],
                out_specs=row_spec(out_w),
                compiler_params=cp,
                cost_estimate=pl.CostEstimate(flops=l2_flops + l3_flops, transcendentals=0,
                                              bytes_accessed=h1_bytes + w_bytes + B * out_w * isz),
            )(h1c, w2eff, b2eff, wout, bout)
        else:
            slab = pl.pallas_call(
                functools.partial(_final_from_x_kernel, cdt=cdt),
                out_shape=jax.ShapeDtypeStruct((B, out_w), cdt),
                grid=(n_tiles,),
                in_specs=x_in_specs + [wspec(h1_dim, h2_dim), wspec(1, h2_dim),
                                       wspec(h2_dim, out_w), wspec(1, out_w)],
                out_specs=row_spec(out_w),
                compiler_params=cp,
                cost_estimate=pl.CostEstimate(flops=l1_flops + l2_flops + l3_flops,
                                              transcendentals=0,
                                              bytes_accessed=x_bytes + w_bytes + B * out_w * isz),
            )(xa, xb, raw, w1af, w1bf, w1rf, b1, w2eff, b2eff, wout, bout)
    else:
        slab = (jnp.dot(h2_full.astype(cdt), wout, preferred_element_type=jnp.float32)
                + bout).astype(cdt)

    rep = slab[:, :h2_dim]
    logits = slab[:, h2_dim:h2_dim + k_classes]
    return logits, rep


# --------------------------------------------------------------------------- reference & init


def init_params(key, comb_dim: int, k_classes: int, output_feature_dim: int = 32):
    """Synthetic parameters, PyTorch-equivalent shapes (weights stored (in, out))."""
    in_dim = 3 * comb_dim + 2
    h1, h2 = 64, output_feature_dim
    keys = jax.random.split(key, 7)

    def lin(k, fan_in, fan_out):
        bound = 1.0 / jnp.sqrt(jnp.float32(fan_in))
        kw, kb = jax.random.split(k)
        w = jax.random.uniform(kw, (fan_in, fan_out), jnp.float32, -bound, bound)
        b = jax.random.uniform(kb, (1, fan_out), jnp.float32, -bound, bound)
        return w, b

    w1, b1 = lin(keys[0], in_dim, h1)
    w2, b2 = lin(keys[1], h1, h2)
    w3, b3 = lin(keys[2], h2, k_classes)
    # PyTorch defaults are gamma=1, beta=0; perturb so the affine-folding path is exercised.
    g1 = 1.0 + 0.1 * jax.random.normal(keys[3], (1, h1), jnp.float32)
    be1 = 0.1 * jax.random.normal(keys[4], (1, h1), jnp.float32)
    g2 = 1.0 + 0.1 * jax.random.normal(keys[5], (1, h2), jnp.float32)
    be2 = 0.1 * jax.random.normal(keys[6], (1, h2), jnp.float32)
    return dict(w1=w1, b1=b1, g1=g1, be1=be1, w2=w2, b2=b2, g2=g2, be2=be2, w3=w3, b3=b3)


def reference(xa, xb, raw, params):
    """Pure-JAX f32 reference matching the PyTorch module (training-mode BatchNorm)."""
    x = jnp.concatenate([xa, xb, xa - xb, raw], axis=-1)
    h = jnp.maximum(x @ params["w1"] + params["b1"], 0.0)
    m = h.mean(0, keepdims=True)
    v = ((h - m) ** 2).mean(0, keepdims=True)
    h = (h - m) / jnp.sqrt(v + BN_EPS) * params["g1"] + params["be1"]
    h2 = jnp.maximum(h @ params["w2"] + params["b2"], 0.0)
    m2 = h2.mean(0, keepdims=True)
    v2 = ((h2 - m2) ** 2).mean(0, keepdims=True)
    rep = (h2 - m2) / jnp.sqrt(v2 + BN_EPS) * params["g2"] + params["be2"]
    logits = rep @ params["w3"] + params["b3"]
    return logits, rep


if __name__ == "__main__":
    comb_dim, k_classes, odim = 10, 5, 32

    key = jax.random.PRNGKey(0)
    k_xa, k_xb, k_raw, k_p = jax.random.split(key, 4)
    params = init_params(k_p, comb_dim, k_classes, odim)

    # ---- small batch (single, ragged tile) -------------------------------------------------
    B = 8
    xa = jax.random.normal(k_xa, (B, comb_dim), jnp.float32)
    xb = jax.random.normal(k_xb, (B, comb_dim), jnp.float32)
    raw = jax.random.normal(k_raw, (B, 2), jnp.float32)
    ref_logits, ref_rep = reference(xa, xb, raw, params)

    # f32 activation path: tight check against the PyTorch-semantics reference.
    logits32, rep32 = edge_feature_net(
        xa, xb, raw, params, k_classes=k_classes, output_feature_dim=odim,
        compute_dtype=jnp.float32)
    jax.block_until_ready((logits32, rep32))
    assert logits32.shape == (B, k_classes) and rep32.shape == (B, odim)
    assert jnp.allclose(logits32, ref_logits, atol=2e-3, rtol=2e-3)
    assert jnp.allclose(rep32, ref_rep, atol=2e-3, rtol=2e-3)

    # h1-cache kernel variants (forced on; auto-selection keeps it off at this feature width).
    logits_c, rep_c = edge_feature_net(
        xa, xb, raw, params, k_classes=k_classes, output_feature_dim=odim,
        compute_dtype=jnp.float32, cache_h1=True)
    jax.block_until_ready((logits_c, rep_c))
    assert jnp.allclose(logits_c, ref_logits, atol=2e-3, rtol=2e-3)
    assert jnp.allclose(rep_c, ref_rep, atol=2e-3, rtol=2e-3)

    # bf16 activation-traffic path (default): check against the identical folded math run in XLA.
    logits_bf, rep_bf = edge_feature_net(
        xa, xb, raw, params, k_classes=k_classes, output_feature_dim=odim)
    logits_x, rep_x = edge_feature_net(
        xa, xb, raw, params, k_classes=k_classes, output_feature_dim=odim, use_pallas=False)
    jax.block_until_ready((logits_bf, rep_bf, logits_x, rep_x))
    assert logits_bf.shape == (B, k_classes) and rep_bf.shape == (B, odim)
    assert jnp.allclose(logits_bf.astype(jnp.float32), logits_x.astype(jnp.float32),
                        atol=2e-2, rtol=2e-2)
    assert jnp.allclose(rep_bf.astype(jnp.float32), rep_x.astype(jnp.float32),
                        atol=2e-2, rtol=2e-2)

    # ---- multi-tile grid with a ragged last tile (masking + megacore-parallel stats path) ----
    B2 = 1000
    k2a, k2b, k2r = jax.random.split(jax.random.PRNGKey(1), 3)
    xa2 = jax.random.normal(k2a, (B2, comb_dim), jnp.float32)
    xb2 = jax.random.normal(k2b, (B2, comb_dim), jnp.float32)
    raw2 = jax.random.normal(k2r, (B2, 2), jnp.float32)
    ref_l2, ref_r2 = reference(xa2, xb2, raw2, params)
    l2, r2 = edge_feature_net(
        xa2, xb2, raw2, params, k_classes=k_classes, output_feature_dim=odim,
        compute_dtype=jnp.float32, tile_batch=256)
    jax.block_until_ready((l2, r2))
    assert l2.shape == (B2, k_classes) and r2.shape == (B2, odim)
    assert jnp.allclose(l2, ref_l2, atol=5e-3, rtol=5e-3)
    assert jnp.allclose(r2, ref_r2, atol=5e-3, rtol=5e-3)

    print("KERNEL_OK")
</pallas_src>

<mosaic_0001>
module attributes {stable_mosaic.version = 11 : i64} {
  func.func @_stats2_from_x_kernel(%arg0: i32, %arg1: memref<16x10xf32, #tpu.memory_space<vmem>>, %arg2: memref<16x10xf32, #tpu.memory_space<vmem>>, %arg3: memref<16x2xf32, #tpu.memory_space<vmem>>, %arg4: memref<10x64xf32, #tpu.memory_space<vmem>>, %arg5: memref<10x64xf32, #tpu.memory_space<vmem>>, %arg6: memref<2x64xf32, #tpu.memory_space<vmem>>, %arg7: memref<1x64xf32, #tpu.memory_space<vmem>>, %arg8: memref<64x32xf32, #tpu.memory_space<vmem>>, %arg9: memref<1x32xf32, #tpu.memory_space<vmem>>, %arg10: memref<1x2x32xf32, #tpu.memory_space<vmem>>) attributes {dimension_semantics = [#tpu.dimension_semantics<parallel>], iteration_bounds = array<i64: 1>, scalar_prefetch = 0 : i64, scratch_operands = 0 : i64, tpu.core_type = #tpu.core_type<tc>, window_params = [{transform_indices = @transform_0, window_bounds = array<i64: 16, 10>}, {transform_indices = @transform_1, window_bounds = array<i64: 16, 10>}, {transform_indices = @transform_2, window_bounds = array<i64: 16, 2>}, {pipeline_mode = #tpu.pipeline_mode<synchronous>, transform_indices = @transform_3, window_bounds = array<i64: 10, 64>}, {pipeline_mode = #tpu.pipeline_mode<synchronous>, transform_indices = @transform_4, window_bounds = array<i64: 10, 64>}, {pipeline_mode = #tpu.pipeline_mode<synchronous>, transform_indices = @transform_5, window_bounds = array<i64: 2, 64>}, {pipeline_mode = #tpu.pipeline_mode<synchronous>, transform_indices = @transform_6, window_bounds = array<i64: 1, 64>}, {pipeline_mode = #tpu.pipeline_mode<synchronous>, transform_indices = @transform_7, window_bounds = array<i64: 64, 32>}, {pipeline_mode = #tpu.pipeline_mode<synchronous>, transform_indices = @transform_8, window_bounds = array<i64: 1, 32>}, {transform_indices = @transform_9, window_bounds = array<i64: 1, 2, 32>}]} {
    %c0 = arith.constant 0 : index
    %c0_0 = arith.constant 0 : index
    %0 = vector.load %arg1[%c0, %c0_0] : memref<16x10xf32, #tpu.memory_space<vmem>>, vector<16x10xf32>
    %c0_1 = arith.constant 0 : index
    %c0_2 = arith.constant 0 : index
    %1 = vector.load %arg2[%c0_1, %c0_2] : memref<16x10xf32, #tpu.memory_space<vmem>>, vector<16x10xf32>
    %c0_3 = arith.constant 0 : index
    %c0_4 = arith.constant 0 : index
    %2 = vector.load %arg3[%c0_3, %c0_4] : memref<16x2xf32, #tpu.memory_space<vmem>>, vector<16x2xf32>
    %c0_5 = arith.constant 0 : index
    %c0_6 = arith.constant 0 : index
    %3 = vector.load %arg4[%c0_5, %c0_6] : memref<10x64xf32, #tpu.memory_space<vmem>>, vector<10x64xf32>
    %c0_7 = arith.constant 0 : index
    %c0_8 = arith.constant 0 : index
    %4 = vector.load %arg5[%c0_7, %c0_8] : memref<10x64xf32, #tpu.memory_space<vmem>>, vector<10x64xf32>
    %c0_9 = arith.constant 0 : index
    %c0_10 = arith.constant 0 : index
    %5 = vector.load %arg6[%c0_9, %c0_10] : memref<2x64xf32, #tpu.memory_space<vmem>>, vector<2x64xf32>
    %c0_11 = arith.constant 0 : index
    %c0_12 = arith.constant 0 : index
    %6 = vector.load %arg7[%c0_11, %c0_12] : memref<1x64xf32, #tpu.memory_space<vmem>>, vector<1x64xf32>
    %cst = arith.constant dense<0.000000e+00> : vector<16x64xf32>
    %7 = tpu.matmul %0, %3, %cst {dimension_numbers = #tpu.dot_dimension_numbers<[1], [0], [0], [1], [0, 0, 1, 1], [], []>} : vector<16x10xf32>, vector<10x64xf32>, vector<16x64xf32> -> vector<16x64xf32>
    %cst_13 = arith.constant dense<0.000000e+00> : vector<16x64xf32>
    %8 = tpu.matmul %1, %4, %cst_13 {dimension_numbers = #tpu.dot_dimension_numbers<[1], [0], [0], [1], [0, 0, 1, 1], [], []>} : vector<16x10xf32>, vector<10x64xf32>, vector<16x64xf32> -> vector<16x64xf32>
    %9 = arith.addf %7, %8 : vector<16x64xf32>
    %cst_14 = arith.constant dense<0.000000e+00> : vector<16x64xf32>
    %10 = tpu.matmul %2, %5, %cst_14 {dimension_numbers = #tpu.dot_dimension_numbers<[1], [0], [0], [1], [0, 0, 1, 1], [], []>} : vector<16x2xf32>, vector<2x64xf32>, vector<16x64xf32> -> vector<16x64xf32>
    %11 = arith.addf %9, %10 : vector<16x64xf32>
    %12 = vector.broadcast %6 : vector<1x64xf32> to vector<16x64xf32>
    %13 = arith.addf %11, %12 : vector<16x64xf32>
    %cst_15 = arith.constant 0.000000e+00 : f32
    %14 = vector.broadcast %cst_15 : f32 to vector<16x64xf32>
    %15 = arith.maximumf %13, %14 : vector<16x64xf32>
    %c0_16 = arith.constant 0 : index
    %c0_17 = arith.constant 0 : index
    %16 = vector.load %arg8[%c0_16, %c0_17] : memref<64x32xf32, #tpu.memory_space<vmem>>, vector<64x32xf32>
    %c0_18 = arith.constant 0 : index
    %c0_19 = arith.constant 0 : index
    %17 = vector.load %arg9[%c0_18, %c0_19] : memref<1x32xf32, #tpu.memory_space<vmem>>, vector<1x32xf32>
    %cst_20 = arith.constant dense<0.000000e+00> : vector<16x32xf32>
    %18 = tpu.matmul %15, %16, %cst_20 {dimension_numbers = #tpu.dot_dimension_numbers<[1], [0], [0], [1], [0, 0, 1, 1], [], []>} : vector<16x64xf32>, vector<64x32xf32>, vector<16x32xf32> -> vector<16x32xf32>
    %19 = vector.broadcast %17 : vector<1x32xf32> to vector<16x32xf32>
    %20 = arith.addf %18, %19 : vector<16x32xf32>
    %cst_21 = arith.constant 0.000000e+00 : f32
    %21 = vector.broadcast %cst_21 : f32 to vector<16x32xf32>
    %22 = arith.maximumf %20, %21 : vector<16x32xf32>
    %c0_i32 = arith.constant 0 : i32
    %23 = arith.cmpi ne, %arg0, %c0_i32 : i32
    %24 = arith.extui %23 : i1 to i32
    %c0_i32_22 = arith.constant 0 : i32
    %25 = arith.cmpi ne, %24, %c0_i32_22 : i32
    scf.if %25 {
      %cst_25 = arith.constant dense<0.000000e+00> : vector<32xf32>
      %29 = vector.multi_reduction <add>, %22, %cst_25 [0] : vector<16x32xf32> to vector<32xf32>
      %30 = vector.shape_cast %29 : vector<32xf32> to vector<1x32xf32>
      %31 = arith.mulf %22, %22 : vector<16x32xf32>
      %cst_26 = arith.constant dense<0.000000e+00> : vector<32xf32>
      %32 = vector.multi_reduction <add>, %31, %cst_26 [0] : vector<16x32xf32> to vector<32xf32>
      %33 = vector.shape_cast %32 : vector<32xf32> to vector<1x32xf32>
      %34 = tpu.concatenate %30, %33 in 0 : vector<1x32xf32>, vector<1x32xf32> -> vector<2x32xf32>
      %35 = vector.shape_cast %34 : vector<2x32xf32> to vector<1x2x32xf32>
      %c0_27 = arith.constant 0 : index
      %c0_28 = arith.constant 0 : index
      %c0_29 = arith.constant 0 : index
      %36 = vector.load %arg10[%c0_27, %c0_28, %c0_29] : memref<1x2x32xf32, #tpu.memory_space<vmem>>, vector<1x2x32xf32>
      tpu.vector_store %arg10[%c0_27, %c0_28, %c0_29], %35 {strides = array<i32>} : memref<1x2x32xf32, #tpu.memory_space<vmem>>, vector<1x2x32xf32>,
    } else {
    }
    %c0_i32_23 = arith.constant 0 : i32
    %26 = arith.cmpi eq, %arg0, %c0_i32_23 : i32
    %27 = arith.extui %26 : i1 to i32
    %c0_i32_24 = arith.constant 0 : i32
    %28 = arith.cmpi ne, %27, %c0_i32_24 : i32
    scf.if %28 {
      %c16_i32 = arith.constant 16 : i32
      %29 = arith.muli %arg0, %c16_i32 : i32
      %30 = tpu.iota {dimensions = array<i32: 0>} : vector<16x1xi32>
      %31 = vector.broadcast %29 : i32 to vector<16x1xi32>
      %32 = arith.addi %31, %30 : vector<16x1xi32>
      %c8_i32 = arith.constant 8 : i32
      %33 = vector.broadcast %c8_i32 : i32 to vector<16x1xi32>
      %34 = arith.cmpi slt, %32, %33 : vector<16x1xi32>
      %cst_25 = arith.constant 0.000000e+00 : f32
      %35 = vector.shape_cast %34 : vector<16x1xi1> to vector<16x1xi1>
      %36 = vector.broadcast %35 : vector<16x1xi1> to vector<16x32xi1>
      %37 = vector.broadcast %cst_25 : f32 to vector<16x32xf32>
      %38 = arith.select %36, %22, %37 : vector<16x32xi1>, vector<16x32xf32>
      %cst_26 = arith.constant dense<0.000000e+00> : vector<32xf32>
      %39 = vector.multi_reduction <add>, %38, %cst_26 [0] : vector<16x32xf32> to vector<32xf32>
      %40 = vector.shape_cast %39 : vector<32xf32> to vector<1x32xf32>
      %41 = arith.mulf %38, %38 : vector<16x32xf32>
      %cst_27 = arith.constant dense<0.000000e+00> : vector<32xf32>
      %42 = vector.multi_reduction <add>, %41, %cst_27 [0] : vector<16x32xf32> to vector<32xf32>
      %43 = vector.shape_cast %42 : vector<32xf32> to vector<1x32xf32>
      %44 = tpu.concatenate %40, %43 in 0 : vector<1x32xf32>, vector<1x32xf32> -> vector<2x32xf32>
      %45 = vector.shape_cast %44 : vector<2x32xf32> to vector<1x2x32xf32>
      %c0_28 = arith.constant 0 : index
      %c0_29 = arith.constant 0 : index
      %c0_30 = arith.constant 0 : index
      %46 = vector.load %arg10[%c0_28, %c0_29, %c0_30] : memref<1x2x32xf32, #tpu.memory_space<vmem>>, vector<1x2x32xf32>
      tpu.vector_store %arg10[%c0_28, %c0_29, %c0_30], %45 {strides = array<i32>} : memref<1x2x32xf32, #tpu.memory_space<vmem>>, vector<1x2x32xf32>,
    } else {
    }
    return
  }
  func.func @transform_0(%arg0: i32) -> (i32, i32) {
    %c0_i32 = arith.constant 0 : i32
    %c0_i32_0 = arith.constant 0 : i32
    return %arg0, %c0_i32 : i32, i32
  }
  func.func @transform_1(%arg0: i32) -> (i32, i32) {
    %c0_i32 = arith.constant 0 : i32
    %c0_i32_0 = arith.constant 0 : i32
    return %arg0, %c0_i32 : i32, i32
  }
  func.func @transform_2(%arg0: i32) -> (i32, i32) {
    %c0_i32 = arith.constant 0 : i32
    %c0_i32_0 = arith.constant 0 : i32
    return %arg0, %c0_i32 : i32, i32
  }
  func.func @transform_3(%arg0: i32) -> (i32, i32) {
    %c0_i32 = arith.constant 0 : i32
    %c0_i32_0 = arith.constant 0 : i32
    %c0_i32_1 = arith.constant 0 : i32
    return %c0_i32, %c0_i32_0 : i32, i32
  }
  func.func @transform_4(%arg0: i32) -> (i32, i32) {
    %c0_i32 = arith.constant 0 : i32
    %c0_i32_0 = arith.constant 0 : i32
    %c0_i32_1 = arith.constant 0 : i32
    return %c0_i32, %c0_i32_0 : i32, i32
  }
  func.func @transform_5(%arg0: i32) -> (i32, i32) {
    %c0_i32 = arith.constant 0 : i32
    %c0_i32_0 = arith.constant 0 : i32
    %c0_i32_1 = arith.constant 0 : i32
    return %c0_i32, %c0_i32_0 : i32, i32
  }
  func.func @transform_6(%arg0: i32) -> (i32, i32) {
    %c0_i32 = arith.constant 0 : i32
    %c0_i32_0 = arith.constant 0 : i32
    %c0_i32_1 = arith.constant 0 : i32
    return %c0_i32, %c0_i32_0 : i32, i32
  }
  func.func @transform_7(%arg0: i32) -> (i32, i32) {
    %c0_i32 = arith.constant 0 : i32
    %c0_i32_0 = arith.constant 0 : i32
    %c0_i32_1 = arith.constant 0 : i32
    return %c0_i32, %c0_i32_0 : i32, i32
  }
  func.func @transform_8(%arg0: i32) -> (i32, i32) {
    %c0_i32 = arith.constant 0 : i32
    %c0_i32_0 = arith.constant 0 : i32
    %c0_i32_1 = arith.constant 0 : i32
    return %c0_i32, %c0_i32_0 : i32, i32
  }
  func.func @transform_9(%arg0: i32) -> (i32, i32, i32) {
    %c0_i32 = arith.constant 0 : i32
    %c0_i32_0 = arith.constant 0 : i32
    %c0_i32_1 = arith.constant 0 : i32
    return %arg0, %c0_i32, %c0_i32_0 : i32, i32, i32
  }
}

module attributes {stable_mosaic.version = 11 : i64} {
  func.func @_final_from_x_kernel(%arg0: i32, %arg1: memref<16x10xf32, #tpu.memory_space<vmem>>, %arg2: memref<16x10xf32, #tpu.memory_space<vmem>>, %arg3: memref<16x2xf32, #tpu.memory_space<vmem>>, %arg4: memref<10x64xf32, #tpu.memory_space<vmem>>, %arg5: memref<10x64xf32, #tpu.memory_space<vmem>>, %arg6: memref<2x64xf32, #tpu.memory_space<vmem>>, %arg7: memref<1x64xf32, #tpu.memory_space<vmem>>, %arg8: memref<64x32xf32, #tpu.memory_space<vmem>>, %arg9: memref<1x32xf32, #tpu.memory_space<vmem>>, %arg10: memref<32x64xf32, #tpu.memory_space<vmem>>, %arg11: memref<1x64xf32, #tpu.memory_space<vmem>>, %arg12: memref<16x64xf32, #tpu.memory_space<vmem>>) attributes {dimension_semantics = [#tpu.dimension_semantics<parallel>], iteration_bounds = array<i64: 1>, scalar_prefetch = 0 : i64, scratch_operands = 0 : i64, tpu.core_type = #tpu.core_type<tc>, window_params = [{transform_indices = @transform_0, window_bounds = array<i64: 16, 10>}, {transform_indices = @transform_1, window_bounds = array<i64: 16, 10>}, {transform_indices = @transform_2, window_bounds = array<i64: 16, 2>}, {pipeline_mode = #tpu.pipeline_mode<synchronous>, transform_indices = @transform_3, window_bounds = array<i64: 10, 64>}, {pipeline_mode = #tpu.pipeline_mode<synchronous>, transform_indices = @transform_4, window_bounds = array<i64: 10, 64>}, {pipeline_mode = #tpu.pipeline_mode<synchronous>, transform_indices = @transform_5, window_bounds = array<i64: 2, 64>}, {pipeline_mode = #tpu.pipeline_mode<synchronous>, transform_indices = @transform_6, window_bounds = array<i64: 1, 64>}, {pipeline_mode = #tpu.pipeline_mode<synchronous>, transform_indices = @transform_7, window_bounds = array<i64: 64, 32>}, {pipeline_mode = #tpu.pipeline_mode<synchronous>, transform_indices = @transform_8, window_bounds = array<i64: 1, 32>}, {pipeline_mode = #tpu.pipeline_mode<synchronous>, transform_indices = @transform_9, window_bounds = array<i64: 32, 64>}, {pipeline_mode = #tpu.pipeline_mode<synchronous>, transform_indices = @transform_10, window_bounds = array<i64: 1, 64>}, {transform_indices = @transform_11, window_bounds = array<i64: 16, 64>}]} {
    %c0 = arith.constant 0 : index
    %c0_0 = arith.constant 0 : index
    %0 = vector.load %arg1[%c0, %c0_0] : memref<16x10xf32, #tpu.memory_space<vmem>>, vector<16x10xf32>
    %c0_1 = arith.constant 0 : index
    %c0_2 = arith.constant 0 : index
    %1 = vector.load %arg2[%c0_1, %c0_2] : memref<16x10xf32, #tpu.memory_space<vmem>>, vector<16x10xf32>
    %c0_3 = arith.constant 0 : index
    %c0_4 = arith.constant 0 : index
    %2 = vector.load %arg3[%c0_3, %c0_4] : memref<16x2xf32, #tpu.memory_space<vmem>>, vector<16x2xf32>
    %c0_5 = arith.constant 0 : index
    %c0_6 = arith.constant 0 : index
    %3 = vector.load %arg4[%c0_5, %c0_6] : memref<10x64xf32, #tpu.memory_space<vmem>>, vector<10x64xf32>
    %c0_7 = arith.constant 0 : index
    %c0_8 = arith.constant 0 : index
    %4 = vector.load %arg5[%c0_7, %c0_8] : memref<10x64xf32, #tpu.memory_space<vmem>>, vector<10x64xf32>
    %c0_9 = arith.constant 0 : index
    %c0_10 = arith.constant 0 : index
    %5 = vector.load %arg6[%c0_9, %c0_10] : memref<2x64xf32, #tpu.memory_space<vmem>>, vector<2x64xf32>
    %c0_11 = arith.constant 0 : index
    %c0_12 = arith.constant 0 : index
    %6 = vector.load %arg7[%c0_11, %c0_12] : memref<1x64xf32, #tpu.memory_space<vmem>>, vector<1x64xf32>
    %cst = arith.constant dense<0.000000e+00> : vector<16x64xf32>
    %7 = tpu.matmul %0, %3, %cst {dimension_numbers = #tpu.dot_dimension_numbers<[1], [0], [0], [1], [0, 0, 1, 1], [], []>} : vector<16x10xf32>, vector<10x64xf32>, vector<16x64xf32> -> vector<16x64xf32>
    %cst_13 = arith.constant dense<0.000000e+00> : vector<16x64xf32>
    %8 = tpu.matmul %1, %4, %cst_13 {dimension_numbers = #tpu.dot_dimension_numbers<[1], [0], [0], [1], [0, 0, 1, 1], [], []>} : vector<16x10xf32>, vector<10x64xf32>, vector<16x64xf32> -> vector<16x64xf32>
    %9 = arith.addf %7, %8 : vector<16x64xf32>
    %cst_14 = arith.constant dense<0.000000e+00> : vector<16x64xf32>
    %10 = tpu.matmul %2, %5, %cst_14 {dimension_numbers = #tpu.dot_dimension_numbers<[1], [0], [0], [1], [0, 0, 1, 1], [], []>} : vector<16x2xf32>, vector<2x64xf32>, vector<16x64xf32> -> vector<16x64xf32>
    %11 = arith.addf %9, %10 : vector<16x64xf32>
    %12 = vector.broadcast %6 : vector<1x64xf32> to vector<16x64xf32>
    %13 = arith.addf %11, %12 : vector<16x64xf32>
    %cst_15 = arith.constant 0.000000e+00 : f32
    %14 = vector.broadcast %cst_15 : f32 to vector<16x64xf32>
    %15 = arith.maximumf %13, %14 : vector<16x64xf32>
    %c0_16 = arith.constant 0 : index
    %c0_17 = arith.constant 0 : index
    %16 = vector.load %arg8[%c0_16, %c0_17] : memref<64x32xf32, #tpu.memory_space<vmem>>, vector<64x32xf32>
    %c0_18 = arith.constant 0 : index
    %c0_19 = arith.constant 0 : index
    %17 = vector.load %arg9[%c0_18, %c0_19] : memref<1x32xf32, #tpu.memory_space<vmem>>, vector<1x32xf32>
    %cst_20 = arith.constant dense<0.000000e+00> : vector<16x32xf32>
    %18 = tpu.matmul %15, %16, %cst_20 {dimension_numbers = #tpu.dot_dimension_numbers<[1], [0], [0], [1], [0, 0, 1, 1], [], []>} : vector<16x64xf32>, vector<64x32xf32>, vector<16x32xf32> -> vector<16x32xf32>
    %19 = vector.broadcast %17 : vector<1x32xf32> to vector<16x32xf32>
    %20 = arith.addf %18, %19 : vector<16x32xf32>
    %cst_21 = arith.constant 0.000000e+00 : f32
    %21 = vector.broadcast %cst_21 : f32 to vector<16x32xf32>
    %22 = arith.maximumf %20, %21 : vector<16x32xf32>
    %c0_22 = arith.constant 0 : index
    %c0_23 = arith.constant 0 : index
    %23 = vector.load %arg10[%c0_22, %c0_23] : memref<32x64xf32, #tpu.memory_space<vmem>>, vector<32x64xf32>
    %cst_24 = arith.constant dense<0.000000e+00> : vector<16x64xf32>
    %24 = tpu.matmul %22, %23, %cst_24 {dimension_numbers = #tpu.dot_dimension_numbers<[1], [0], [0], [1], [0, 0, 1, 1], [], []>} : vector<16x32xf32>, vector<32x64xf32>, vector<16x64xf32> -> vector<16x64xf32>
    %c0_25 = arith.constant 0 : index
    %c0_26 = arith.constant 0 : index
    %25 = vector.load %arg11[%c0_25, %c0_26] : memref<1x64xf32, #tpu.memory_space<vmem>>, vector<1x64xf32>
    %26 = vector.broadcast %25 : vector<1x64xf32> to vector<16x64xf32>
    %27 = arith.addf %24, %26 : vector<16x64xf32>
    %c0_27 = arith.constant 0 : index
    %c0_28 = arith.constant 0 : index
    %28 = vector.load %arg12[%c0_27, %c0_28] : memref<16x64xf32, #tpu.memory_space<vmem>>, vector<16x64xf32>
    tpu.vector_store %arg12[%c0_27, %c0_28], %27 {strides = array<i32>} : memref<16x64xf32, #tpu.memory_space<vmem>>, vector<16x64xf32>,
    return
  }
  func.func @transform_0(%arg0: i32) -> (i32, i32) {
    %c0_i32 = arith.constant 0 : i32
    %c0_i32_0 = arith.constant 0 : i32
    return %arg0, %c0_i32 : i32, i32
  }
  func.func @transform_1(%arg0: i32) -> (i32, i32) {
    %c0_i32 = arith.constant 0 : i32
    %c0_i32_0 = arith.constant 0 : i32
    return %arg0, %c0_i32 : i32, i32
  }
  func.func @transform_2(%arg0: i32) -> (i32, i32) {
    %c0_i32 = arith.constant 0 : i32
    %c0_i32_0 = arith.constant 0 : i32
    return %arg0, %c0_i32 : i32, i32
  }
  func.func @transform_3(%arg0: i32) -> (i32, i32) {
    %c0_i32 = arith.constant 0 : i32
    %c0_i32_0 = arith.constant 0 : i32
    %c0_i32_1 = arith.constant 0 : i32
    return %c0_i32, %c0_i32_0 : i32, i32
  }
  func.func @transform_4(%arg0: i32) -> (i32, i32) {
    %c0_i32 = arith.constant 0 : i32
    %c0_i32_0 = arith.constant 0 : i32
    %c0_i32_1 = arith.constant 0 : i32
    return %c0_i32, %c0_i32_0 : i32, i32
  }
  func.func @transform_5(%arg0: i32) -> (i32, i32) {
    %c0_i32 = arith.constant 0 : i32
    %c0_i32_0 = arith.constant 0 : i32
    %c0_i32_1 = arith.constant 0 : i32
    return %c0_i32, %c0_i32_0 : i32, i32
  }
  func.func @transform_6(%arg0: i32) -> (i32, i32) {
    %c0_i32 = arith.constant 0 : i32
    %c0_i32_0 = arith.constant 0 : i32
    %c0_i32_1 = arith.constant 0 : i32
    return %c0_i32, %c0_i32_0 : i32, i32
  }
  func.func @transform_7(%arg0: i32) -> (i32, i32) {
    %c0_i32 = arith.constant 0 : i32
    %c0_i32_0 = arith.constant 0 : i32
    %c0_i32_1 = arith.constant 0 : i32
    return %c0_i32, %c0_i32_0 : i32, i32
  }
  func.func @transform_8(%arg0: i32) -> (i32, i32) {
    %c0_i32 = arith.constant 0 : i32
    %c0_i32_0 = arith.constant 0 : i32
    %c0_i32_1 = arith.constant 0 : i32
    return %c0_i32, %c0_i32_0 : i32, i32
  }
  func.func @transform_9(%arg0: i32) -> (i32, i32) {
    %c0_i32 = arith.constant 0 : i32
    %c0_i32_0 = arith.constant 0 : i32
    %c0_i32_1 = arith.constant 0 : i32
    return %c0_i32, %c0_i32_0 : i32, i32
  }
  func.func @transform_10(%arg0: i32) -> (i32, i32) {
    %c0_i32 = arith.constant 0 : i32
    %c0_i32_0 = arith.constant 0 : i32
    %c0_i32_1 = arith.constant 0 : i32
    return %c0_i32, %c0_i32_0 : i32, i32
  }
  func.func @transform_11(%arg0: i32) -> (i32, i32) {
    %c0_i32 = arith.constant 0 : i32
    %c0_i32_0 = arith.constant 0 : i32
    return %arg0, %c0_i32 : i32, i32
  }
}

module attributes {stable_mosaic.version = 11 : i64} {
  func.func @_stats1_kernel(%arg0: i32, %arg1: memref<16x10xf32, #tpu.memory_space<vmem>>, %arg2: memref<16x10xf32, #tpu.memory_space<vmem>>, %arg3: memref<16x2xf32, #tpu.memory_space<vmem>>, %arg4: memref<10x64xf32, #tpu.memory_space<vmem>>, %arg5: memref<10x64xf32, #tpu.memory_space<vmem>>, %arg6: memref<2x64xf32, #tpu.memory_space<vmem>>, %arg7: memref<1x64xf32, #tpu.memory_space<vmem>>, %arg8: memref<1x2x64xf32, #tpu.memory_space<vmem>>) attributes {dimension_semantics = [#tpu.dimension_semantics<parallel>], iteration_bounds = array<i64: 1>, scalar_prefetch = 0 : i64, scratch_operands = 0 : i64, tpu.core_type = #tpu.core_type<tc>, window_params = [{transform_indices = @transform_0, window_bounds = array<i64: 16, 10>}, {transform_indices = @transform_1, window_bounds = array<i64: 16, 10>}, {transform_indices = @transform_2, window_bounds = array<i64: 16, 2>}, {pipeline_mode = #tpu.pipeline_mode<synchronous>, transform_indices = @transform_3, window_bounds = array<i64: 10, 64>}, {pipeline_mode = #tpu.pipeline_mode<synchronous>, transform_indices = @transform_4, window_bounds = array<i64: 10, 64>}, {pipeline_mode = #tpu.pipeline_mode<synchronous>, transform_indices = @transform_5, window_bounds = array<i64: 2, 64>}, {pipeline_mode = #tpu.pipeline_mode<synchronous>, transform_indices = @transform_6, window_bounds = array<i64: 1, 64>}, {transform_indices = @transform_7, window_bounds = array<i64: 1, 2, 64>}]} {
    %c0 = arith.constant 0 : index
    %c0_0 = arith.constant 0 : index
    %0 = vector.load %arg1[%c0, %c0_0] : memref<16x10xf32, #tpu.memory_space<vmem>>, vector<16x10xf32>
    %c0_1 = arith.constant 0 : index
    %c0_2 = arith.constant 0 : index
    %1 = vector.load %arg2[%c0_1, %c0_2] : memref<16x10xf32, #tpu.memory_space<vmem>>, vector<16x10xf32>
    %c0_3 = arith.constant 0 : index
    %c0_4 = arith.constant 0 : index
    %2 = vector.load %arg3[%c0_3, %c0_4] : memref<16x2xf32, #tpu.memory_space<vmem>>, vector<16x2xf32>
    %c0_5 = arith.constant 0 : index
    %c0_6 = arith.constant 0 : index
    %3 = vector.load %arg4[%c0_5, %c0_6] : memref<10x64xf32, #tpu.memory_space<vmem>>, vector<10x64xf32>
    %c0_7 = arith.constant 0 : index
    %c0_8 = arith.constant 0 : index
    %4 = vector.load %arg5[%c0_7, %c0_8] : memref<10x64xf32, #tpu.memory_space<vmem>>, vector<10x64xf32>
    %c0_9 = arith.constant 0 : index
    %c0_10 = arith.constant 0 : index
    %5 = vector.load %arg6[%c0_9, %c0_10] : memref<2x64xf32, #tpu.memory_space<vmem>>, vector<2x64xf32>
    %c0_11 = arith.constant 0 : index
    %c0_12 = arith.constant 0 : index
    %6 = vector.load %arg7[%c0_11, %c0_12] : memref<1x64xf32, #tpu.memory_space<vmem>>, vector<1x64xf32>
    %cst = arith.constant dense<0.000000e+00> : vector<16x64xf32>
    %7 = tpu.matmul %0, %3, %cst {dimension_numbers = #tpu.dot_dimension_numbers<[1], [0], [0], [1], [0, 0, 1, 1], [], []>} : vector<16x10xf32>, vector<10x64xf32>, vector<16x64xf32> -> vector<16x64xf32>
    %cst_13 = arith.constant dense<0.000000e+00> : vector<16x64xf32>
    %8 = tpu.matmul %1, %4, %cst_13 {dimension_numbers = #tpu.dot_dimension_numbers<[1], [0], [0], [1], [0, 0, 1, 1], [], []>} : vector<16x10xf32>, vector<10x64xf32>, vector<16x64xf32> -> vector<16x64xf32>
    %9 = arith.addf %7, %8 : vector<16x64xf32>
    %cst_14 = arith.constant dense<0.000000e+00> : vector<16x64xf32>
    %10 = tpu.matmul %2, %5, %cst_14 {dimension_numbers = #tpu.dot_dimension_numbers<[1], [0], [0], [1], [0, 0, 1, 1], [], []>} : vector<16x2xf32>, vector<2x64xf32>, vector<16x64xf32> -> vector<16x64xf32>
    %11 = arith.addf %9, %10 : vector<16x64xf32>
    %12 = vector.broadcast %6 : vector<1x64xf32> to vector<16x64xf32>
    %13 = arith.addf %11, %12 : vector<16x64xf32>
    %cst_15 = arith.constant 0.000000e+00 : f32
    %14 = vector.broadcast %cst_15 : f32 to vector<16x64xf32>
    %15 = arith.maximumf %13, %14 : vector<16x64xf32>
    %c0_i32 = arith.constant 0 : i32
    %16 = arith.cmpi ne, %arg0, %c0_i32 : i32
    %17 = arith.extui %16 : i1 to i32
    %c0_i32_16 = arith.constant 0 : i32
    %18 = arith.cmpi ne, %17, %c0_i32_16 : i32
    scf.if %18 {
      %cst_19 = arith.constant dense<0.000000e+00> : vector<64xf32>
      %22 = vector.multi_reduction <add>, %15, %cst_19 [0] : vector<16x64xf32> to vector<64xf32>
      %23 = vector.shape_cast %22 : vector<64xf32> to vector<1x64xf32>
      %24 = arith.mulf %15, %15 : vector<16x64xf32>
      %cst_20 = arith.constant dense<0.000000e+00> : vector<64xf32>
      %25 = vector.multi_reduction <add>, %24, %cst_20 [0] : vector<16x64xf32> to vector<64xf32>
      %26 = vector.shape_cast %25 : vector<64xf32> to vector<1x64xf32>
      %27 = tpu.concatenate %23, %26 in 0 : vector<1x64xf32>, vector<1x64xf32> -> vector<2x64xf32>
      %28 = vector.shape_cast %27 : vector<2x64xf32> to vector<1x2x64xf32>
      %c0_21 = arith.constant 0 : index
      %c0_22 = arith.constant 0 : index
      %c0_23 = arith.constant 0 : index
      %29 = vector.load %arg8[%c0_21, %c0_22, %c0_23] : memref<1x2x64xf32, #tpu.memory_space<vmem>>, vector<1x2x64xf32>
      tpu.vector_store %arg8[%c0_21, %c0_22, %c0_23], %28 {strides = array<i32>} : memref<1x2x64xf32, #tpu.memory_space<vmem>>, vector<1x2x64xf32>,
    } else {
    }
    %c0_i32_17 = arith.constant 0 : i32
    %19 = arith.cmpi eq, %arg0, %c0_i32_17 : i32
    %20 = arith.extui %19 : i1 to i32
    %c0_i32_18 = arith.constant 0 : i32
    %21 = arith.cmpi ne, %20, %c0_i32_18 : i32
    scf.if %21 {
      %c16_i32 = arith.constant 16 : i32
      %22 = arith.muli %arg0, %c16_i32 : i32
      %23 = tpu.iota {dimensions = array<i32: 0>} : vector<16x1xi32>
      %24 = vector.broadcast %22 : i32 to vector<16x1xi32>
      %25 = arith.addi %24, %23 : vector<16x1xi32>
      %c8_i32 = arith.constant 8 : i32
      %26 = vector.broadcast %c8_i32 : i32 to vector<16x1xi32>
      %27 = arith.cmpi slt, %25, %26 : vector<16x1xi32>
      %cst_19 = arith.constant 0.000000e+00 : f32
      %28 = vector.shape_cast %27 : vector<16x1xi1> to vector<16x1xi1>
      %29 = vector.broadcast %28 : vector<16x1xi1> to vector<16x64xi1>
      %30 = vector.broadcast %cst_19 : f32 to vector<16x64xf32>
      %31 = arith.select %29, %15, %30 : vector<16x64xi1>, vector<16x64xf32>
      %cst_20 = arith.constant dense<0.000000e+00> : vector<64xf32>
      %32 = vector.multi_reduction <add>, %31, %cst_20 [0] : vector<16x64xf32> to vector<64xf32>
      %33 = vector.shape_cast %32 : vector<64xf32> to vector<1x64xf32>
      %34 = arith.mulf %31, %31 : vector<16x64xf32>
      %cst_21 = arith.constant dense<0.000000e+00> : vector<64xf32>
      %35 = vector.multi_reduction <add>, %34, %cst_21 [0] : vector<16x64xf32> to vector<64xf32>
      %36 = vector.shape_cast %35 : vector<64xf32> to vector<1x64xf32>
      %37 = tpu.concatenate %33, %36 in 0 : vector<1x64xf32>, vector<1x64xf32> -> vector<2x64xf32>
      %38 = vector.shape_cast %37 : vector<2x64xf32> to vector<1x2x64xf32>
      %c0_22 = arith.constant 0 : index
      %c0_23 = arith.constant 0 : index
      %c0_24 = arith.constant 0 : index
      %39 = vector.load %arg8[%c0_22, %c0_23, %c0_24] : memref<1x2x64xf32, #tpu.memory_space<vmem>>, vector<1x2x64xf32>
      tpu.vector_store %arg8[%c0_22, %c0_23, %c0_24], %38 {strides = array<i32>} : memref<1x2x64xf32, #tpu.memory_space<vmem>>, vector<1x2x64xf32>,
    } else {
    }
    return
  }
  func.func @transform_0(%arg0: i32) -> (i32, i32) {
    %c0_i32 = arith.constant 0 : i32
    %c0_i32_0 = arith.constant 0 : i32
    return %arg0, %c0_i32 : i32, i32
  }
  func.func @transform_1(%arg0: i32) -> (i32, i32) {
    %c0_i32 = arith.constant 0 : i32
    %c0_i32_0 = arith.constant 0 : i32
    return %arg0, %c0_i32 : i32, i32
  }
  func.func @transform_2(%arg0: i32) -> (i32, i32) {
    %c0_i32 = arith.constant 0 : i32
    %c0_i32_0 = arith.constant 0 : i32
    return %arg0, %c0_i32 : i32, i32
  }
  func.func @transform_3(%arg0: i32) -> (i32, i32) {
    %c0_i32 = arith.constant 0 : i32
    %c0_i32_0 = arith.constant 0 : i32
    %c0_i32_1 = arith.constant 0 : i32
    return %c0_i32, %c0_i32_0 : i32, i32
  }
  func.func @transform_4(%arg0: i32) -> (i32, i32) {
    %c0_i32 = arith.constant 0 : i32
    %c0_i32_0 = arith.constant 0 : i32
    %c0_i32_1 = arith.constant 0 : i32
    return %c0_i32, %c0_i32_0 : i32, i32
  }
  func.func @transform_5(%arg0: i32) -> (i32, i32) {
    %c0_i32 = arith.constant 0 : i32
    %c0_i32_0 = arith.constant 0 : i32
    %c0_i32_1 = arith.constant 0 : i32
    return %c0_i32, %c0_i32_0 : i32, i32
  }
  func.func @transform_6(%arg0: i32) -> (i32, i32) {
    %c0_i32 = arith.constant 0 : i32
    %c0_i32_0 = arith.constant 0 : i32
    %c0_i32_1 = arith.constant 0 : i32
    return %c0_i32, %c0_i32_0 : i32, i32
  }
  func.func @transform_7(%arg0: i32) -> (i32, i32, i32) {
    %c0_i32 = arith.constant 0 : i32
    %c0_i32_0 = arith.constant 0 : i32
    %c0_i32_1 = arith.constant 0 : i32
    return %arg0, %c0_i32, %c0_i32_0 : i32, i32, i32
  }
}

</mosaic_0001>

<bundles_post_ra>
// kernel: edge_feature_net.4
= control target key start
LH: loop header
LB: loop body
LE: loop exit
PB: predicated region body
PF: predicated region fallthrough
CT: control target
= control target key end

     0   :  { %vm51_vm0 = vcmask 1041408   ;;  %vm110_vm1 = vcmask 15360   ;;  %vm44_vm2 = vcmask 80896   ;;  %vm164_vm3 = vcmask 523264   ;;  %s419_s5 = inlined_call_operand.vmem [shape: f32[2,64], index: 5, kind: input, shape index: {}]   ;;  %s420_s2 = inlined_call_operand.vmem [shape: f32[8,2], index: 2, kind: input, shape index: {}]   ;;  %s421_s4 = inlined_call_operand.vmem [shape: f32[10,64], index: 4, kind: input, shape index: {}]   ;;  %s422_s3 = inlined_call_operand.vmem [shape: f32[10,64], index: 3, kind: input, shape index: {}]   ;;  %s423_s1 = inlined_call_operand.vmem [shape: f32[8,10], index: 1, kind: input, shape index: {}]   ;;  %s424_s0 = inlined_call_operand.vmem [shape: f32[8,10], index: 0, kind: input, shape index: {}]   ;;  %s425_s7 = inlined_call_operand.vmem [shape: f32[64,32], index: 7, kind: input, shape index: {}]   ;;  %s426_s6 = inlined_call_operand.vmem [shape: f32[1,64], index: 6, kind: input, shape index: {}]   ;;  %s427_s8 = inlined_call_operand.vmem [shape: f32[1,32], index: 8, kind: input, shape index: {}]   ;;  %s428_s9 = inlined_call_operand.vmem [shape: f32[1,2,32], index: 9, kind: output, shape index: {}]  }
   0x1   :  { %v42_v0 = vld [vmem:[%s419_s5] sm:$0x3]  ;;  %v41_v2 = vld [vmem:[%s421_s4 + $0x8] sm:$0x3]  ;;  %v159_v8 = vld [vmem:[%s425_s7 + $0x38] sm:$0xff]  ;;  %vm244_vm4 = vcmask 261120  }
   0x2   :  { %v36_v1 = vld [vmem:[%s420_s2] sm:$0xff]  ;;  %279 = vmatpush.msk.msra.mxu2 %vm51_vm0, %v42_v0  ;;  %273 = vmatpush.msk.msra.mxu0 %vm51_vm0, %v41_v2  ;;  %v39_v3 = vld [vmem:[%s422_s3 + $0x8] sm:$0x3]  ;;  %v158_v9 = vld [vmem:[%s425_s7 + $0x30] sm:$0xff]  ;;  %vm265_vm5 = vcmask 1040384   ;;  %vm267_vm6 = vcmask 254976  }
   0x3   :  { %v40_v4 = vld [vmem:[%s421_s4] sm:$0xff]  ;;  %280 = vmatmul.msk.f32.vlgmr.msra.gmra.mxu2 %vm110_vm1, %v36_v1  ;;  %276 = vmatpush.msk.msra.mxu1 %vm51_vm0, %v39_v3  ;;  %v157_v10 = vld [vmem:[%s425_s7 + $0x28] sm:$0xff]  ;;  %v155_v15 = vld [vmem:[%s425_s7 + $0x18] sm:$0xff] }
   0x4   :  { %v38_v5 = vld [vmem:[%s422_s3] sm:$0xff]  ;;  %70 = vmatpush.msra.mxu0 %v40_v4  ;;  %179 = vmatpush.msrb.mxu2 %v159_v8  ;;  %v37_v11 = vld [vmem:[%s420_s2 + $0x8] sm:$0xff]  ;;  %v154_v16 = vld [vmem:[%s425_s7 + $0x10] sm:$0xff] }
   0x5   :  { %v34_v6 = vld [vmem:[%s423_s1] sm:$0xff]  ;;  %102 = vmatpush.msra.mxu1 %v38_v5  ;;  %284 = vmatpush.msra.mxu3 %v159_v8  ;;  %v35_v13 = vld [vmem:[%s423_s1 + $0x8] sm:$0xff] }
   0x6   :  { %v32_v7 = vld [vmem:[%s424_s0] sm:$0xff]  ;;  %274 = vmatmul.msk.f32.vlgmr.msra.gmra.mxu0 %vm44_vm2, %v34_v6  ;;  %180 = vmatpush.msrb.mxu2 %v158_v9  ;;  %v33_v14 = vld [vmem:[%s424_s0 + $0x8] sm:$0xff] }
   0x7   :  { %277 = vmatmul.msk.f32.vlgmr.msra.gmra.mxu1 %vm44_vm2, %v32_v7  ;;  %v156_v12 = vld [vmem:[%s425_s7 + $0x20] sm:$0xff]  ;;  %285 = vmatpush.msra.mxu3 %v158_v9  ;;  %v153_v17 = vld [vmem:[%s425_s7 + $0x8] sm:$0xff] }
   0x8   :  { %181 = vmatpush.msrb.mxu2 %v157_v10  ;;  %v152_v18 = vld [vmem:[%s425_s7] sm:$0xff] }
   0x9   :  { %286 = vmatpush.msra.mxu3 %v157_v10  ;;  %v292_v22 = vld [vmem:[%s426_s6] ss:$0 sm:$0xff] }
   0xa   :  { %182 = vmatpush.msrb.mxu2 %v156_v12  ;;  %v293_v34 = vld [vmem:[%s427_s8] ss:$0 sm:$0xff] }
   0xb   :  { %281 = vmatmul.msk.f32.gmra.mxu2 %vm110_vm1, %v37_v11  ;;  %287 = vmatpush.msra.mxu3 %v156_v12 }
   0xc   :  { %183 = vmatpush.msrb.mxu2 %v155_v15 }
   0xd   :  { %288 = vmatpush.msra.mxu3 %v155_v15 }
   0xe   :  { %275 = vmatmul.msk.f32.gmra.mxu0 %vm44_vm2, %v35_v13  ;;  %184 = vmatpush.msrb.mxu2 %v154_v16 }
   0xf   :  { %278 = vmatmul.msk.f32.gmra.mxu1 %vm44_vm2, %v33_v14  ;;  %289 = vmatpush.msra.mxu3 %v154_v16 }
  0x10   :  { %185 = vmatpush.msrb.mxu2 %v153_v17 }
  0x11   :  { %290 = vmatpush.msra.mxu3 %v153_v17 }
  0x12   :  { %186 = vmatpush.msrb.mxu2 %v152_v18 }
  0x13   :  { %291 = vmatpush.msra.mxu3 %v152_v18 }
  0x83   :  { %v72_v19 = vpop.f32.mrf.mxu0 }
  0x84   :  { %v104_v20 = vpop.f32.mrf.mxu1 }
  0x85   :  { %v105_v21 = vadd.f32 %v104_v20, %v72_v19 }
  0x86   :  { %v137_v23 = vpop.f32.mrf.mxu2 }
  0x87   :  { %v143_v24 = vadd.f32 %v137_v23, %v105_v21 }
  0x89   :  { %v148_v25 = vadd.f32 %v292_v22, %v143_v24 }
  0x8b   :  { %v75_v26 = vpop.f32.mrf.mxu0  ;;  %v150_v27 = vmax.f32 %v148_v25, 0.0 }
  0x8c   :  { %v107_v28 = vpop.f32.mrf.mxu1 }
  0x8d   :  { %v108_v29 = vadd.f32 %v107_v28, %v75_v26  ;;  %282 = vmatmul.msk.f32.vlgmr.msrb.gmra.mxu2 %vm164_vm3, %v150_v27 }
  0x8e   :  { %v140_v30 = vpop.f32.mrf.mxu2 }
  0x8f   :  { %v144_v31 = vadd.f32 %v140_v30, %v108_v29 }
  0x91   :  { %v149_v32 = vadd.f32 %v292_v22, %v144_v31 }
  0x93   :  { %v151_v33 = vmax.f32 %v149_v32, 0.0 }
  0x95   :  { %283 = vmatmul.msk.f32.vlgmr.msra.gmra.mxu3 %vm164_vm3, %v151_v33 }
 0x110   :  { %v188_v35 = vpop.f32.mrf.mxu2 }
 0x111   :  { %v189_v36 = vadd.f32 %v293_v34, %v188_v35 }
 0x113   :  { %v194_v37 = vmax.f32 %v189_v36, 0.0 }
 0x115   :  { %v245_v38 = vsel %vm244_vm4, %v194_v37, 0.0  ;;  %v254_v39 = vmul.f32 %v194_v37, %v194_v37 }
 0x116   :  { %v248_v40 = vrot.slane %v245_v38, 4 }
 0x117   :  { %v256_v41 = vsel %vm244_vm4, %v254_v39, 0.0 }
 0x118   :  { %v249_v42 = vadd.f32 %v248_v40, %v245_v38  ;;  %v259_v43 = vrot.slane %v256_v41, 4  ;;  %v191_v44 = vpop.f32.mrf.mxu3 }
 0x11a   :  { %v250_v45 = vrot.slane %v249_v42, 2  ;;  %v260_v46 = vadd.f32 %v259_v43, %v256_v41 }
 0x11c   :  { %v251_v47 = vadd.f32 %v250_v45, %v249_v42  ;;  %v261_v48 = vrot.slane %v260_v46, 2 }
 0x11e   :  { %v252_v49 = vrot.slane %v251_v47, 1  ;;  %v262_v50 = vadd.f32 %v261_v48, %v260_v46 }
 0x120   :  { %v263_v51 = vrot.slane %v262_v50, 1  ;;  %v253_v52 = vadd.f32 %v252_v49, %v251_v47 }
 0x122   :  { %v264_v53 = vadd.f32 %v263_v51, %v262_v50 }
 0x124   :  { %v266_v54 = vsel %vm265_vm5, %v253_v52, %v264_v53 }
 0x125   :  { %268 = vst.msk [vmem:[%s428_s9] sm:$0x3] %vm267_vm6, %v266_v54 }

// kernel: edge_feature_net.5
= control target key start
LH: loop header
LB: loop body
LE: loop exit
PB: predicated region body
PF: predicated region fallthrough
CT: control target
= control target key end

     0   :  { %vm57_vm0 = vcmask 1041408   ;;  %vm116_vm1 = vcmask 15360   ;;  %vm50_vm2 = vcmask 80896   ;;  %vm170_vm3 = vcmask 523264   ;;  %s456_s0 = inlined_call_operand.vmem [shape: f32[8,10], index: 0, kind: input, shape index: {}]   ;;  %s457_s1 = inlined_call_operand.vmem [shape: f32[8,10], index: 1, kind: input, shape index: {}]   ;;  %s458_s2 = inlined_call_operand.vmem [shape: f32[8,2], index: 2, kind: input, shape index: {}]   ;;  %s459_s3 = inlined_call_operand.vmem [shape: f32[10,64], index: 3, kind: input, shape index: {}]   ;;  %s460_s4 = inlined_call_operand.vmem [shape: f32[10,64], index: 4, kind: input, shape index: {}]   ;;  %s461_s5 = inlined_call_operand.vmem [shape: f32[2,64], index: 5, kind: input, shape index: {}]   ;;  %s462_s6 = inlined_call_operand.vmem [shape: f32[1,64], index: 6, kind: input, shape index: {}]   ;;  %s463_s7 = inlined_call_operand.vmem [shape: f32[64,32], index: 7, kind: input, shape index: {}]   ;;  %s464_s8 = inlined_call_operand.vmem [shape: f32[1,32], index: 8, kind: input, shape index: {}]   ;;  %s465_s9 = inlined_call_operand.vmem [shape: f32[32,64], index: 9, kind: input, shape index: {}]   ;;  %s466_s10 = inlined_call_operand.vmem [shape: f32[1,64], index: 10, kind: input, shape index: {}]   ;;  %s467_s11 = inlined_call_operand.vmem [shape: f32[8,64], index: 11, kind: output, shape index: {}]  }
   0x1   :  { %v47_v0 = vld [vmem:[%s460_s4 + $0x8] sm:$0x3]  ;;  %v42_v2 = vld [vmem:[%s458_s2] sm:$0xff]  ;;  %v165_v9 = vld [vmem:[%s463_s7 + $0x38] sm:$0xff]  ;;  %vm210_vm4 = vcmask 261120  }
   0x2   :  { %v45_v1 = vld [vmem:[%s459_s3 + $0x8] sm:$0x3]  ;;  %283 = vmatpush.msk.msra.mxu0 %vm57_vm0, %v47_v0  ;;  %v48_v3 = vld [vmem:[%s461_s5] sm:$0x3]  ;;  %v164_v10 = vld [vmem:[%s463_s7 + $0x30] sm:$0xff] }
   0x3   :  { %286 = vmatpush.msk.msra.mxu1 %vm57_vm0, %v45_v1  ;;  %v46_v4 = vld [vmem:[%s460_s4] sm:$0xff]  ;;  %289 = vmatpush.msk.msra.mxu2 %vm57_vm0, %v48_v3  ;;  %v43_v8 = vld [vmem:[%s458_s2 + $0x8] sm:$0xff]  ;;  %v161_v15 = vld [vmem:[%s463_s7 + $0x18] sm:$0xff] }
   0x4   :  { %v44_v5 = vld [vmem:[%s459_s3] sm:$0xff]  ;;  %296 = vmatpush.msk.msra.mxu3 %vm57_vm0, %v48_v3  ;;  %290 = vmatmul.msk.f32.vlgmr.msra.gmra.mxu2 %vm116_vm1, %v42_v2  ;;  %v41_v11 = vld [vmem:[%s457_s1 + $0x8] sm:$0xff]  ;;  %v160_v16 = vld [vmem:[%s463_s7 + $0x10] sm:$0xff] }
   0x5   :  { %v40_v6 = vld [vmem:[%s457_s1] sm:$0xff]  ;;  %76 = vmatpush.msra.mxu0 %v46_v4  ;;  %108 = vmatpush.msra.mxu1 %v44_v5  ;;  %v39_v12 = vld [vmem:[%s456_s0 + $0x8] sm:$0xff]  ;;  %v205_v19 = vld [vmem:[%s465_s9 + $0x18] sm:$0xff] }
   0x6   :  { %v38_v7 = vld [vmem:[%s456_s0] sm:$0xff]  ;;  %284 = vmatmul.msk.f32.vlgmr.msra.gmra.mxu0 %vm50_vm2, %v40_v6  ;;  %291 = vmatmul.msk.f32.vlgmr.msra.gmra.mxu3 %vm116_vm1, %v43_v8  ;;  %v163_v13 = vld [vmem:[%s463_s7 + $0x28] sm:$0xff]  ;;  %v204_v35 = vld [vmem:[%s465_s9 + $0x10] sm:$0xff] }
   0x7   :  { %287 = vmatmul.msk.f32.vlgmr.msra.gmra.mxu1 %vm50_vm2, %v38_v7  ;;  %297 = vmatpush.msrb.mxu3 %v165_v9  ;;  %v162_v14 = vld [vmem:[%s463_s7 + $0x20] sm:$0xff]  ;;  %v159_v17 = vld [vmem:[%s463_s7 + $0x8] sm:$0xff] }
   0x8   :  { %185 = vmatpush.msrb.mxu1 %v165_v9  ;;  %v158_v18 = vld [vmem:[%s463_s7] sm:$0xff]  ;;  %229 = vmatpush.msrb.mxu2 %v205_v19  ;;  %v203_v36 = vld [vmem:[%s465_s9 + $0x8] sm:$0xff] }
   0x9   :  { %298 = vmatpush.msrb.mxu3 %v164_v10  ;;  %v305_v23 = vld [vmem:[%s462_s6] ss:$0 sm:$0xff] }
   0xa   :  { %186 = vmatpush.msrb.mxu1 %v164_v10  ;;  %230 = vmatpush.msrb.mxu2 %v204_v35  ;;  %v202_v37 = vld [vmem:[%s465_s9] sm:$0xff] }
   0xb   :  { %299 = vmatpush.msrb.mxu3 %v163_v13  ;;  %v306_v38 = vld [vmem:[%s464_s8] ss:$0 sm:$0xff] }
   0xc   :  { %187 = vmatpush.msrb.mxu1 %v163_v13  ;;  %231 = vmatpush.msrb.mxu2 %v203_v36  ;;  %v307_v45 = vld [vmem:[%s466_s10] ss:$0 sm:$0xff] }
   0xd   :  { %300 = vmatpush.msrb.mxu3 %v162_v14 }
   0xe   :  { %285 = vmatmul.msk.f32.gmra.mxu0 %vm50_vm2, %v41_v11  ;;  %188 = vmatpush.msrb.mxu1 %v162_v14 }
   0xf   :  { %288 = vmatmul.msk.f32.gmra.mxu1 %vm50_vm2, %v39_v12  ;;  %301 = vmatpush.msrb.mxu3 %v161_v15 }
  0x10   :  { %189 = vmatpush.msrb.mxu1 %v161_v15  ;;  %232 = vmatpush.msrb.mxu2 %v202_v37 }
  0x11   :  { %302 = vmatpush.msrb.mxu3 %v160_v16 }
  0x12   :  { %190 = vmatpush.msrb.mxu1 %v160_v16 }
  0x13   :  { %303 = vmatpush.msrb.mxu3 %v159_v17 }
  0x14   :  { %191 = vmatpush.msrb.mxu1 %v159_v17 }
  0x15   :  { %304 = vmatpush.msrb.mxu3 %v158_v18 }
  0x16   :  { %192 = vmatpush.msrb.mxu1 %v158_v18 }
  0x83   :  { %v78_v20 = vpop.f32.mrf.mxu0 }
  0x84   :  { %v110_v21 = vpop.f32.mrf.mxu1 }
  0x85   :  { %v111_v22 = vadd.f32 %v110_v21, %v78_v20 }
  0x87   :  { %v143_v24 = vpop.f32.mrf.mxu2 }
  0x88   :  { %v149_v25 = vadd.f32 %v143_v24, %v111_v22 }
  0x89   :  { %v146_v29 = vpop.f32.mrf.mxu3 }
  0x8a   :  { %v154_v26 = vadd.f32 %v305_v23, %v149_v25 }
  0x8b   :  { %v81_v27 = vpop.f32.mrf.mxu0 }
  0x8c   :  { %v113_v28 = vpop.f32.mrf.mxu1  ;;  %v156_v30 = vmax.f32 %v154_v26, 0.0 }
  0x8d   :  { %v114_v31 = vadd.f32 %v113_v28, %v81_v27 }
  0x8e   :  { %292 = vmatmul.msk.f32.vlgmr.msrb.gmra.mxu1 %vm170_vm3, %v156_v30 }
  0x8f   :  { %v150_v32 = vadd.f32 %v146_v29, %v114_v31 }
  0x91   :  { %v155_v33 = vadd.f32 %v305_v23, %v150_v32 }
  0x93   :  { %v157_v34 = vmax.f32 %v155_v33, 0.0 }
  0x95   :  { %293 = vmatmul.msk.f32.vlgmr.msrb.gmra.mxu3 %vm170_vm3, %v157_v34 }
 0x10b   :  { %v194_v39 = vpop.f32.mrf.mxu1 }
 0x10c   :  { %v195_v40 = vadd.f32 %v306_v38, %v194_v39 }
 0x10e   :  { %v200_v41 = vmax.f32 %v195_v40, 0.0 }
 0x110   :  { %294 = vmatmul.msk.f32.vlgmr.msrb.gmra.mxu2 %vm210_vm4, %v200_v41 }
 0x118   :  { %v197_v42 = vpop.f32.mrf.mxu3 }
 0x119   :  { %v198_v43 = vadd.f32 %v306_v38, %v197_v42 }
 0x11b   :  { %v201_v44 = vmax.f32 %v198_v43, 0.0 }
 0x11d   :  { %295 = vmatmul.msk.f32.gmra.mxu2 %vm210_vm4, %v201_v44 }
 0x193   :  { %v234_v46 = vpop.f32.mrf.mxu2 }
 0x194   :  { %v235_v47 = vadd.f32 %v307_v45, %v234_v46 }
 0x196   :  { %240 = vst.msk [vmem:[#allocation2] sm:$0xff] %vm170_vm3, %v235_v47 }
 0x19d   :  { %v272_v48 = vld [vmem:[#allocation2] sm:$0xff] }
 0x19e   :  { %273 = vst [vmem:[%s467_s11] sm:$0xff] %v272_v48 }
 0x1a0   :  { %v237_v49 = vpop.f32.mrf.mxu2 }

// kernel: edge_feature_net.3
= control target key start
LH: loop header
LB: loop body
LE: loop exit
PB: predicated region body
PF: predicated region fallthrough
CT: control target
= control target key end

     0   :  { %vm45_vm0 = vcmask 1041408   ;;  %vm104_vm1 = vcmask 15360   ;;  %vm38_vm2 = vcmask 80896   ;;  %vm194_vm3 = vcmask 523264   ;;  %s324_s5 = inlined_call_operand.vmem [shape: f32[2,64], index: 5, kind: input, shape index: {}]   ;;  %s325_s2 = inlined_call_operand.vmem [shape: f32[8,2], index: 2, kind: input, shape index: {}]   ;;  %s326_s4 = inlined_call_operand.vmem [shape: f32[10,64], index: 4, kind: input, shape index: {}]   ;;  %s327_s3 = inlined_call_operand.vmem [shape: f32[10,64], index: 3, kind: input, shape index: {}]   ;;  %s328_s1 = inlined_call_operand.vmem [shape: f32[8,10], index: 1, kind: input, shape index: {}]   ;;  %s329_s0 = inlined_call_operand.vmem [shape: f32[8,10], index: 0, kind: input, shape index: {}]   ;;  %s330_s6 = inlined_call_operand.vmem [shape: f32[1,64], index: 6, kind: input, shape index: {}]   ;;  %s331_s7 = inlined_call_operand.vmem [shape: f32[1,2,64], index: 7, kind: output, shape index: {}]  }
   0x1   :  { %v36_v0 = vld [vmem:[%s324_s5] sm:$0x3]  ;;  %v35_v2 = vld [vmem:[%s326_s4 + $0x8] sm:$0x3]  ;;  %vm215_vm4 = vcmask 1040384   ;;  %vm217_vm5 = vcmask 517120  }
   0x2   :  { %v30_v1 = vld [vmem:[%s325_s2] sm:$0xff]  ;;  %229 = vmatpush.msk.msra.mxu2 %vm45_vm0, %v36_v0  ;;  %223 = vmatpush.msk.msra.mxu0 %vm45_vm0, %v35_v2  ;;  %v33_v3 = vld [vmem:[%s327_s3 + $0x8] sm:$0x3] }
   0x3   :  { %v34_v4 = vld [vmem:[%s326_s4] sm:$0xff]  ;;  %230 = vmatmul.msk.f32.vlgmr.msra.gmra.mxu2 %vm104_vm1, %v30_v1  ;;  %226 = vmatpush.msk.msra.mxu1 %vm45_vm0, %v33_v3  ;;  %v29_v8 = vld [vmem:[%s328_s1 + $0x8] sm:$0xff] }
   0x4   :  { %v32_v5 = vld [vmem:[%s327_s3] sm:$0xff]  ;;  %64 = vmatpush.msra.mxu0 %v34_v4  ;;  %232 = vmatpush.msk.msra.mxu3 %vm45_vm0, %v35_v2  ;;  %v31_v9 = vld [vmem:[%s325_s2 + $0x8] sm:$0xff] }
   0x5   :  { %v28_v6 = vld [vmem:[%s328_s1] sm:$0xff]  ;;  %96 = vmatpush.msra.mxu1 %v32_v5  ;;  %v27_v10 = vld [vmem:[%s329_s0 + $0x8] sm:$0xff] }
   0x6   :  { %v26_v7 = vld [vmem:[%s329_s0] sm:$0xff]  ;;  %224 = vmatmul.msk.f32.vlgmr.msra.gmra.mxu0 %vm38_vm2, %v28_v6  ;;  %233 = vmatpush.msra.mxu3 %v34_v4 }
   0x7   :  { %227 = vmatmul.msk.f32.vlgmr.msra.gmra.mxu1 %vm38_vm2, %v26_v7  ;;  %225 = vmatmul.msk.f32.vlgmr.msra.gmra.mxu3 %vm38_vm2, %v29_v8  ;;  %v234_v14 = vld [vmem:[%s330_s6] ss:$0 sm:$0xff] }
   0xb   :  { %231 = vmatmul.msk.f32.gmra.mxu2 %vm104_vm1, %v31_v9 }
   0xf   :  { %228 = vmatmul.msk.f32.gmra.mxu1 %vm38_vm2, %v27_v10 }
  0x83   :  { %v66_v11 = vpop.f32.mrf.mxu0 }
  0x84   :  { %v98_v12 = vpop.f32.mrf.mxu1 }
  0x85   :  { %v99_v13 = vadd.f32 %v98_v12, %v66_v11 }
  0x86   :  { %v131_v15 = vpop.f32.mrf.mxu2 }
  0x87   :  { %v137_v16 = vadd.f32 %v131_v15, %v99_v13 }
  0x89   :  { %v142_v17 = vadd.f32 %v234_v14, %v137_v16 }
  0x8a   :  { %v69_v18 = vpop.f32.mrf.mxu3 }
  0x8b   :  { %v144_v19 = vmax.f32 %v142_v17, 0.0 }
  0x8c   :  { %v101_v20 = vpop.f32.mrf.mxu1 }
  0x8d   :  { %v195_v21 = vsel %vm194_vm3, %v144_v19, 0.0  ;;  %v204_v22 = vmul.f32 %v144_v19, %v144_v19 }
  0x8e   :  { %v198_v23 = vrot.slane %v195_v21, 4  ;;  %v134_v24 = vpop.f32.mrf.mxu2 }
  0x8f   :  { %v206_v25 = vsel %vm194_vm3, %v204_v22, 0.0 }
  0x90   :  { %v199_v26 = vadd.f32 %v198_v23, %v195_v21  ;;  %v209_v27 = vrot.slane %v206_v25, 4 }
  0x92   :  { %v200_v28 = vrot.slane %v199_v26, 2  ;;  %v210_v29 = vadd.f32 %v209_v27, %v206_v25 }
  0x94   :  { %v201_v30 = vadd.f32 %v200_v28, %v199_v26  ;;  %v211_v31 = vrot.slane %v210_v29, 2 }
  0x96   :  { %v202_v32 = vrot.slane %v201_v30, 1  ;;  %v212_v33 = vadd.f32 %v211_v31, %v210_v29 }
  0x98   :  { %v213_v34 = vrot.slane %v212_v33, 1  ;;  %v203_v35 = vadd.f32 %v202_v32, %v201_v30 }
  0x9a   :  { %v214_v36 = vadd.f32 %v213_v34, %v212_v33 }
  0x9c   :  { %v216_v37 = vsel %vm215_vm4, %v203_v35, %v214_v36 }
  0x9d   :  { %218 = vst.msk [vmem:[%s331_s7] sm:$0x3] %vm217_vm5, %v216_v37 }

</bundles_post_ra>
